<compile_context>
chip_gen: v6e
topology: v6e:2x2x1
jax: 0.10.0
libtpu: 0.0.40
codegen_flags: <defaults>
</compile_context>

<pallas_src>
import functools

import jax
import jax.numpy as jnp
from jax import lax
from jax.experimental import pallas as pl
from jax.experimental.pallas import tpu as pltpu


def _pick_row_tile(n, target=256):
    """Largest divisor of n that is <= target and a multiple of 8 (else n)."""
    if n <= target:
        return n
    for tm in range(target, 7, -8):
        if n % tm == 0:
            return tm
    return n


def _round_up(v, m):
    return ((v + m - 1) // m) * m


def _serial_fps_loop(row_fn, out_ref, n, npoint):
    """mmcv furthest_point_sample_with_dist over rows produced by `row_fn`.

    row_fn(last) -> (1, n) squared distances from point `last` to all points.
    Indices are written one scalar per iteration into out_ref (block shape
    (1, npoint, 1)) via dynamic-sublane stores (no carried index vector).
    """
    lane_iota = lax.broadcasted_iota(jnp.int32, (1, n), 1)

    # idx[0] = 0 (mmcv convention)
    out_ref[:, 0:1, :] = jnp.zeros((1, 1, 1), jnp.int32)

    mind0 = jnp.full((1, n), 1e10, jnp.float32)          # mmcv `temp` init

    def body(j, carry):
        mind, last = carry
        mind = jnp.minimum(mind, row_fn(last))
        best = jnp.max(mind)
        # argmax with first-occurrence tie break
        nxt = jnp.min(jnp.where(mind == best, lane_iota, n)).astype(jnp.int32)
        # Guard: if `best` is NaN the mask is all-false and the min is n;
        # clamp so the next dynamic row gather can never read out of bounds.
        nxt = jnp.minimum(nxt, n - 1)
        out_ref[:, pl.ds(j, 1), :] = nxt.reshape(1, 1, 1)
        return mind, nxt

    lax.fori_loop(1, npoint, body, (mind0, jnp.int32(0)))


def _col_sq(xbuf_ref, d):
    """|x_j|^2 for all j laid out on lanes as a (1, N) vector.

    A tiny ones-matmul instead of an in-kernel (N,1)->(1,N) relayout.
    """
    x_all = xbuf_ref[...]
    xsq = x_all * x_all
    ones8 = jnp.ones((8, d), jnp.float32)
    return lax.dot_general(ones8, xsq, (((1,), (1,)), ((), ())),
                           preferred_element_type=jnp.float32)[0:1, :]


def _ffps_kernel_ondemand(x_ref, out_ref, xbuf_ref, *, npoint):
    """One batch element per grid step; distance rows built on demand.

    x_ref   : (1, N, D) f32  concatenated [xyz, features]
    out_ref : (1, npoint, 1) i32 sampled indices
    xbuf_ref: (N, D) f32 VMEM scratch (row-gatherable copy of the features)
    """
    n, d = x_ref.shape[1], x_ref.shape[2]
    xbuf_ref[...] = x_ref[0]
    col_sq = _col_sq(xbuf_ref, d)                            # (1, N)

    def row_fn(last):
        xrow = xbuf_ref[pl.ds(last, 1), :]                   # (1, D) row gather
        rsq = jnp.sum(xrow * xrow, axis=1, keepdims=True)    # (1, 1)
        gram = lax.dot_general(                              # (1, N) MXU matvec
            xrow, xbuf_ref[...], (((1,), (1,)), ((), ())),
            preferred_element_type=jnp.float32)
        return rsq + col_sq - 2.0 * gram

    _serial_fps_loop(row_fn, out_ref, n, npoint)


def _ffps_kernel_precompute(x_ref, out_ref, xbuf_ref, dist_ref, *, npoint,
                            row_tile):
    """Gated fast path: build the full (N, N) distance matrix on the MXU
    (fori_loop over row tiles) and gather rows from VMEM in the serial loop."""
    n, d = x_ref.shape[1], x_ref.shape[2]
    xbuf_ref[...] = x_ref[0]
    col_sq = _col_sq(xbuf_ref, d)                            # (1, N)

    tm = row_tile
    num_tiles = n // tm

    def build(t, carry):
        r0 = pl.multiple_of(t * tm, tm)
        xt = xbuf_ref[pl.ds(r0, tm), :]                      # (tm, D)
        gram = lax.dot_general(                              # (tm, N)
            xt, xbuf_ref[...], (((1,), (1,)), ((), ())),
            preferred_element_type=jnp.float32)
        rsq = jnp.sum(xt * xt, axis=1, keepdims=True)        # (tm, 1)
        dist_ref[pl.ds(r0, tm), :] = rsq + col_sq - 2.0 * gram
        return carry

    lax.fori_loop(0, num_tiles, build, 0)

    def row_fn(last):
        return dist_ref[pl.ds(last, 1), :]                   # (1, N) row gather

    _serial_fps_loop(row_fn, out_ref, n, npoint)


def _vmem_cap_bytes():
    try:
        return int(pltpu.get_tpu_info().vmem_capacity_bytes)
    except Exception:
        return 64 << 20   # v7x per-TC VMEM, the smallest of any generation


def _vmem_need_bytes(n, d, npoint, row_tile, with_dist):
    lane_n = _round_up(n, 128)
    lane_d = _round_up(d, 128)
    sub_n = _round_up(n, 8)
    x_block = sub_n * lane_d * 4
    need = 2 * x_block                             # double-buffered input block
    need += x_block                                # xbuf scratch
    need += x_block                                # xsq temporary
    need += 2 * _round_up(npoint, 8) * 128 * 4     # double-buffered output block
    need += 12 * 8 * lane_n * 4                    # (1,N)/(8,N) loop vectors
    if with_dist:
        need += sub_n * lane_n * 4                 # dist scratch
        need += 3 * _round_up(row_tile, 8) * lane_n * 4   # per-tile temporaries
    return need


def ffps_sample(points, features, npoint, precompute=None):
    """F-FPS sampling.

    points:     (B, N, 3)  float32
    features:   (B, C, N)  float32
    npoint:     static int
    precompute: None (auto), True (force (N,N) matrix), False (on-demand rows)
    returns:    (B, npoint) int32 indices
    """
    B, N, _ = points.shape
    npoint = int(npoint)
    feats_for_fps = jnp.concatenate(
        [points, jnp.swapaxes(features, 1, 2)], axis=2).astype(jnp.float32)
    D = feats_for_fps.shape[-1]

    cap = _vmem_cap_bytes()
    row_tile = _pick_row_tile(N)
    need_pre = _vmem_need_bytes(N, D, npoint, row_tile, True)
    if precompute is None:
        # Keep the full-matrix path only when it fits this generation's VMEM
        # with ample headroom; otherwise use the O(N*D) on-demand path.
        precompute = need_pre + (16 << 20) <= cap
    precompute = bool(precompute)

    need = need_pre if precompute else _vmem_need_bytes(N, D, npoint, row_tile,
                                                        False)
    vmem_limit = int(min(max(need + (16 << 20), 32 << 20), cap))

    scratch = [pltpu.VMEM((N, D), jnp.float32)]
    if precompute:
        kernel = functools.partial(_ffps_kernel_precompute, npoint=npoint,
                                   row_tile=row_tile)
        scratch.append(pltpu.VMEM((N, N), jnp.float32))
    else:
        kernel = functools.partial(_ffps_kernel_ondemand, npoint=npoint)

    out = pl.pallas_call(
        kernel,
        out_shape=jax.ShapeDtypeStruct((B, npoint, 1), jnp.int32),
        grid_spec=pltpu.PrefetchScalarGridSpec(
            num_scalar_prefetch=0,
            grid=(B,),
            in_specs=[pl.BlockSpec((1, N, D), lambda b: (b, 0, 0))],
            out_specs=pl.BlockSpec((1, npoint, 1), lambda b: (b, 0, 0)),
            scratch_shapes=scratch,
        ),
        compiler_params=pltpu.CompilerParams(
            dimension_semantics=("parallel",),
            vmem_limit_bytes=vmem_limit),
    )(feats_for_fps)
    return out.reshape(B, npoint)


def ffps_reference(points, features, npoint):
    """Pure-JAX reference mirroring the PyTorch module (for verification)."""
    feats = jnp.concatenate([points, jnp.swapaxes(features, 1, 2)], axis=2)
    sq = jnp.sum(feats * feats, axis=-1)                     # (B, N)
    gram = jnp.einsum('bnd,bmd->bnm', feats, feats,
                      precision=lax.Precision.HIGHEST)       # (B, N, N)
    dist = sq[:, :, None] + sq[:, None, :] - 2.0 * gram      # (B, N, N)

    B, N = sq.shape
    mind = jnp.full((B, N), 1e10, jnp.float32)
    last = jnp.zeros((B,), jnp.int32)
    idxs = [last]
    for _ in range(1, npoint):
        drow = jnp.take_along_axis(dist, last[:, None, None], axis=1)[:, 0, :]
        mind = jnp.minimum(mind, drow)
        last = jnp.argmax(mind, axis=1).astype(jnp.int32)
        idxs.append(last)
    return jnp.stack(idxs, axis=1)


if __name__ == "__main__":
    B, N, C, npoint = 2, 128, 16, 16

    key = jax.random.PRNGKey(0)
    kp, kf = jax.random.split(key)
    # Integer-valued coordinates/features: all pairwise squared distances are
    # small exact integers even through a single-pass bf16 MXU matmul, so the
    # kernel (DEFAULT precision) and the f32 XLA reference agree bit-exactly
    # and the exact index comparison below is deterministic.
    points = jax.random.randint(kp, (B, N, 3), 0, 8).astype(jnp.float32)
    features = jax.random.randint(kf, (B, C, N), 0, 8).astype(jnp.float32)

    ffps = jax.jit(ffps_sample, static_argnums=(2, 3))
    ref_idx = ffps_reference(points, features, npoint)

    # Exercise auto mode plus both explicit paths (on-demand rows / precompute).
    for mode in (None, False, True):
        fps_idx = jax.block_until_ready(ffps(points, features, npoint, mode))
        assert fps_idx.shape == (B, npoint) and fps_idx.dtype == jnp.int32
        assert bool(jnp.all(fps_idx[:, 0] == 0))
        assert bool(jnp.all((fps_idx >= 0) & (fps_idx < N)))
        for b in range(B):
            assert len({int(i) for i in fps_idx[b]}) == npoint, "duplicate idx"
        assert bool(jnp.all(fps_idx == ref_idx)), (mode, fps_idx, ref_idx)

    # Also run once on generic float data (structural checks only; exact index
    # parity there can legitimately differ by matmul rounding at near-ties).
    pf = jax.random.uniform(kp, (B, N, 3), dtype=jnp.float32)
    ff = jax.random.uniform(kf, (B, C, N), dtype=jnp.float32)
    fidx = jax.block_until_ready(ffps(pf, ff, npoint, None))
    assert fidx.shape == (B, npoint)
    assert bool(jnp.all((fidx >= 0) & (fidx < N)))

    print("KERNEL_OK")
</pallas_src>

<mosaic_0001>
module attributes {stable_mosaic.version = 11 : i64} {
  func.func @_ffps_kernel_precompute(%arg0: i32, %arg1: memref<1x128x19xf32, #tpu.memory_space<vmem>>, %arg2: memref<1x16x1xi32, #tpu.memory_space<vmem>>, %arg3: memref<128x19xf32, #tpu.memory_space<vmem>>, %arg4: memref<128x128xf32, #tpu.memory_space<vmem>>) attributes {dimension_semantics = [#tpu.dimension_semantics<parallel>], iteration_bounds = array<i64: 2>, scalar_prefetch = 0 : i64, scratch_operands = 2 : i64, tpu.core_type = #tpu.core_type<tc>, window_params = [{transform_indices = @transform_0, window_bounds = array<i64: 1, 128, 19>}, {transform_indices = @transform_1, window_bounds = array<i64: 1, 16, 1>}]} {
    %c0 = arith.constant 0 : index
    %c0_0 = arith.constant 0 : index
    %c0_1 = arith.constant 0 : index
    %0 = vector.load %arg1[%c0, %c0_0, %c0_1] : memref<1x128x19xf32, #tpu.memory_space<vmem>>, vector<1x128x19xf32>
    %1 = vector.shape_cast %0 : vector<1x128x19xf32> to vector<128x19xf32>
    %c0_2 = arith.constant 0 : index
    %c0_3 = arith.constant 0 : index
    %2 = vector.load %arg3[%c0_2, %c0_3] : memref<128x19xf32, #tpu.memory_space<vmem>>, vector<128x19xf32>
    tpu.vector_store %arg3[%c0_2, %c0_3], %1 {strides = array<i32>} : memref<128x19xf32, #tpu.memory_space<vmem>>, vector<128x19xf32>,
    %c0_4 = arith.constant 0 : index
    %c0_5 = arith.constant 0 : index
    %3 = vector.load %arg3[%c0_4, %c0_5] : memref<128x19xf32, #tpu.memory_space<vmem>>, vector<128x19xf32>
    %4 = arith.mulf %3, %3 : vector<128x19xf32>
    %cst = arith.constant 1.000000e+00 : f32
    %5 = vector.broadcast %cst : f32 to vector<8x19xf32>
    %cst_6 = arith.constant dense<0.000000e+00> : vector<8x128xf32>
    %6 = tpu.matmul %5, %4, %cst_6 {dimension_numbers = #tpu.dot_dimension_numbers<[1], [1], [0], [0], [0, 0, 1, 0], [], []>} : vector<8x19xf32>, vector<128x19xf32>, vector<8x128xf32> -> vector<8x128xf32>
    %7 = vector.extract_strided_slice %6 {offsets = [0, 0], sizes = [1, 128], strides = [1, 1]} : vector<8x128xf32> to vector<1x128xf32>
    %c0_i32 = arith.constant 0 : i32
    %c128_i32 = arith.constant 128 : i32
    %8 = arith.muli %c0_i32, %c128_i32 : i32
    %9 = tpu.assume_multiple %8, 128 : i32
    %10 = arith.index_cast %9 : i32 to index
    %c0_7 = arith.constant 0 : index
    %11 = vector.load %arg3[%10, %c0_7] : memref<128x19xf32, #tpu.memory_space<vmem>>, vector<128x19xf32>
    %c0_8 = arith.constant 0 : index
    %c0_9 = arith.constant 0 : index
    %12 = vector.load %arg3[%c0_8, %c0_9] : memref<128x19xf32, #tpu.memory_space<vmem>>, vector<128x19xf32>
    %cst_10 = arith.constant dense<0.000000e+00> : vector<128x128xf32>
    %13 = tpu.matmul %11, %12, %cst_10 {dimension_numbers = #tpu.dot_dimension_numbers<[1], [1], [0], [0], [0, 0, 1, 0], [], []>} : vector<128x19xf32>, vector<128x19xf32>, vector<128x128xf32> -> vector<128x128xf32>
    %14 = arith.mulf %11, %11 : vector<128x19xf32>
    %cst_11 = arith.constant dense<0.000000e+00> : vector<128xf32>
    %15 = vector.multi_reduction <add>, %14, %cst_11 [1] : vector<128x19xf32> to vector<128xf32>
    %16 = vector.shape_cast %15 : vector<128xf32> to vector<128x1xf32>
    %17 = vector.broadcast %16 : vector<128x1xf32> to vector<128x128xf32>
    %18 = vector.broadcast %7 : vector<1x128xf32> to vector<128x128xf32>
    %19 = arith.addf %17, %18 : vector<128x128xf32>
    %cst_12 = arith.constant 2.000000e+00 : f32
    %20 = vector.broadcast %cst_12 : f32 to vector<128x128xf32>
    %21 = arith.mulf %20, %13 : vector<128x128xf32>
    %22 = arith.subf %19, %21 : vector<128x128xf32>
    %23 = arith.index_cast %9 : i32 to index
    %c0_13 = arith.constant 0 : index
    %24 = vector.load %arg4[%23, %c0_13] : memref<128x128xf32, #tpu.memory_space<vmem>>, vector<128x128xf32>
    tpu.vector_store %arg4[%23, %c0_13], %22 {strides = array<i32>} : memref<128x128xf32, #tpu.memory_space<vmem>>, vector<128x128xf32>,
    %c1_i32 = arith.constant 1 : i32
    %25 = tpu.iota {dimensions = array<i32: 1>} : vector<1x128xi32>
    %c0_i32_14 = arith.constant 0 : i32
    %26 = vector.broadcast %c0_i32_14 : i32 to vector<1x1x1xi32>
    %c0_15 = arith.constant 0 : index
    %c0_16 = arith.constant 0 : index
    %c0_17 = arith.constant 0 : index
    %27 = vector.load %arg2[%c0_15, %c0_16, %c0_17] : memref<1x16x1xi32, #tpu.memory_space<vmem>>, vector<1x1x1xi32>
    tpu.vector_store %arg2[%c0_15, %c0_16, %c0_17], %26 {strides = array<i32>} : memref<1x16x1xi32, #tpu.memory_space<vmem>>, vector<1x1x1xi32>,
    %cst_18 = arith.constant 1.000000e+10 : f32
    %28 = vector.broadcast %cst_18 : f32 to vector<1x128xf32>
    %c0_i32_19 = arith.constant 0 : i32
    %c1_i32_20 = arith.constant 1 : i32
    %c15_i32 = arith.constant 15 : i32
    %29 = arith.addi %c1_i32_20, %c15_i32 : i32
    %c1_i32_21 = arith.constant 1 : i32
    %30:2 = scf.for %arg5 = %c1_i32_20 to %29 step %c1_i32_21 iter_args(%arg6 = %28, %arg7 = %c0_i32_19) -> (vector<1x128xf32>, i32)  : i32 {
      %31 = arith.index_cast %arg7 : i32 to index
      %c0_23 = arith.constant 0 : index
      %32 = vector.load %arg4[%31, %c0_23] : memref<128x128xf32, #tpu.memory_space<vmem>>, vector<1x128xf32>
      %33 = arith.minimumf %arg6, %32 : vector<1x128xf32>
      %34 = vector.shape_cast %33 : vector<1x128xf32> to vector<1x1x128xf32>
      %cst_24 = arith.constant dense<0xFF800000> : vector<1xf32>
      %35 = vector.multi_reduction <maximumf>, %34, %cst_24 [1, 2] : vector<1x1x128xf32> to vector<1xf32>
      %36 = vector.shape_cast %35 : vector<1xf32> to vector<1x1x1xf32>
      %37 = vector.extract %36[0, 0, 0] : f32 from vector<1x1x1xf32>
      %38 = vector.broadcast %37 : f32 to vector<1x128xf32>
      %39 = arith.cmpf oeq, %33, %38 : vector<1x128xf32>
      %c128_i32_25 = arith.constant 128 : i32
      %40 = vector.broadcast %c128_i32_25 : i32 to vector<1x128xi32>
      %41 = arith.select %39, %25, %40 : vector<1x128xi1>, vector<1x128xi32>
      %42 = vector.shape_cast %41 : vector<1x128xi32> to vector<1x1x128xi32>
      %cst_26 = arith.constant dense<2147483647> : vector<1xi32>
      %43 = vector.multi_reduction <minsi>, %42, %cst_26 [1, 2] : vector<1x1x128xi32> to vector<1xi32>
      %44 = vector.shape_cast %43 : vector<1xi32> to vector<1x1x1xi32>
      %45 = vector.extract %44[0, 0, 0] : i32 from vector<1x1x1xi32>
      %c127_i32 = arith.constant 127 : i32
      %46 = arith.minsi %45, %c127_i32 : i32
      %47 = vector.broadcast %46 : i32 to vector<1x1x1xi32>
      %c0_27 = arith.constant 0 : index
      %48 = arith.index_cast %arg5 : i32 to index
      %c0_28 = arith.constant 0 : index
      %49 = vector.load %arg2[%c0_27, %48, %c0_28] : memref<1x16x1xi32, #tpu.memory_space<vmem>>, vector<1x1x1xi32>
      tpu.vector_store %arg2[%c0_27, %48, %c0_28], %47 {strides = array<i32>} : memref<1x16x1xi32, #tpu.memory_space<vmem>>, vector<1x1x1xi32>,
      scf.yield %33, %46 : vector<1x128xf32>, i32
    }
    %c15_i32_22 = arith.constant 15 : i32
    return
  }
  func.func @transform_0(%arg0: i32) -> (i32, i32, i32) {
    %c0_i32 = arith.constant 0 : i32
    %c0_i32_0 = arith.constant 0 : i32
    %c0_i32_1 = arith.constant 0 : i32
    return %arg0, %c0_i32, %c0_i32_0 : i32, i32, i32
  }
  func.func @transform_1(%arg0: i32) -> (i32, i32, i32) {
    %c0_i32 = arith.constant 0 : i32
    %c0_i32_0 = arith.constant 0 : i32
    %c0_i32_1 = arith.constant 0 : i32
    return %arg0, %c0_i32, %c0_i32_0 : i32, i32, i32
  }
}

</mosaic_0001>

<bundles_post_ra>
// kernel: ffps_sample.1
= control target key start
LH: loop header
LB: loop body
LE: loop exit
PB: predicated region body
PF: predicated region fallthrough
CT: control target
= control target key end

     0   :  { %s1107_s6 = smov 0   ;;  %s1447_s0 = inlined_call_operand.vmem [shape: f32[2,128,19], index: 0, kind: input, shape index: {}]   ;;  %s1448_s1 = inlined_call_operand.vmem [shape: s32[2,16,1], index: 1, kind: output, shape index: {}]  }
   0x1 LB: > { %s819_s7 = sadd.s32 4294967295, %s1079_s6   ;;  %p823_p0 = scmp.ge.s32.totalorder %s1079_s6, 1  ;;  %s1079_s6 = sphi %s1107_s6, %s11_s6  }
   0x2   : > { %p87_p1 = scmp.lt.s32.totalorder %s1079_s6, 3 }
   0x4   : > { %p88_p2 = pnand %p823_p0, %p87_p1 }
   0x5   : > { %p107_p3 = scmp.lt.s32.totalorder (!%p88_p2), %s819_s7, 1  ;;  %s1425_s16 = smov (!%p88_p2), 0  }
   0x6   : > { %91 = sbr.rel (%p88_p2) target bundleno = 882 (0x372), region = 24  ;;  %s1427_s17 = smov (!%p88_p2), 1  }
   0xb   : > { %v1093_v0 = vmov 0.0   ;;  %s1451_s7 = smov (!%p107_p3, %s819_s7), 1  ;;  %vm1094_vm0 = vmmov 0   ;;  %vm694_vm1 = vcmask 0   ;;  %vm133_vm2 = vcmask 154624  }
   0xc   : > { %930 = vmatprep.subr.mxu0 %v1093_v0  ;;  %962 = vmatprep.mubr.msk.f32.mxu0 %vm1094_vm0, %v1093_v0  ;;  %s879_s8 = sshll.u32 %s1451_s7, 7  ;;  %s880_s9 = sshll.u32 %s1451_s7, 4  ;;  %v1095_v2 = vmov 0  }
   0xd   : > { %s1120_s12 = scalar_lea.vmem %s1447_s0, %s879_s8  ;;  %s1125_s15 = scalar_lea.vmem %s1448_s1, %s880_s9 }
   0xe   : > { %v132_v1 = vld [vmem:[%s1120_s12 + $0x78] sm:$0xff]  ;;  %695 = vst.msk [vmem:[%s1125_s15] sm:$0x1] %vm694_vm1, %v1095_v2  ;;  %v131_v3 = vld [vmem:[%s1120_s12 + $0x70] sm:$0xff]  ;;  %v130_v4 = vld [vmem:[%s1120_s12 + $0x68] sm:$0xff] }
   0xf   : > { %149 = vst.msk [vmem:[#allocation2 + $0x78] sm:$0xff] %vm133_vm2, %v132_v1  ;;  %148 = vst.msk [vmem:[#allocation2 + $0x70] sm:$0xff] %vm133_vm2, %v131_v3  ;;  %v129_v5 = vld [vmem:[%s1120_s12 + $0x60] sm:$0xff]  ;;  %v128_v6 = vld [vmem:[%s1120_s12 + $0x58] sm:$0xff]  ;;  %v1096_v3 = vmov 1.0  }
  0x10   : > { %147 = vst.msk [vmem:[#allocation2 + $0x68] sm:$0xff] %vm133_vm2, %v130_v4  ;;  %v127_v7 = vld [vmem:[%s1120_s12 + $0x50] sm:$0xff]  ;;  %146 = vst.msk [vmem:[#allocation2 + $0x60] sm:$0xff] %vm133_vm2, %v129_v5  ;;  %v126_v8 = vld [vmem:[%s1120_s12 + $0x48] sm:$0xff] }
  0x11   : > { %145 = vst.msk [vmem:[#allocation2 + $0x58] sm:$0xff] %vm133_vm2, %v128_v6  ;;  %144 = vst.msk [vmem:[#allocation2 + $0x50] sm:$0xff] %vm133_vm2, %v127_v7  ;;  %v125_v9 = vld [vmem:[%s1120_s12 + $0x40] sm:$0xff]  ;;  %v124_v10 = vld [vmem:[%s1120_s12 + $0x38] sm:$0xff] }
  0x12   : > { %143 = vst.msk [vmem:[#allocation2 + $0x48] sm:$0xff] %vm133_vm2, %v126_v8  ;;  %142 = vst.msk [vmem:[#allocation2 + $0x40] sm:$0xff] %vm133_vm2, %v125_v9  ;;  %v123_v11 = vld [vmem:[%s1120_s12 + $0x30] sm:$0xff]  ;;  %v122_v12 = vld [vmem:[%s1120_s12 + $0x28] sm:$0xff] }
  0x13   : > { %141 = vst.msk [vmem:[#allocation2 + $0x38] sm:$0xff] %vm133_vm2, %v124_v10  ;;  %v121_v13 = vld [vmem:[%s1120_s12 + $0x20] sm:$0xff]  ;;  %140 = vst.msk [vmem:[#allocation2 + $0x30] sm:$0xff] %vm133_vm2, %v123_v11  ;;  %v120_v14 = vld [vmem:[%s1120_s12 + $0x18] sm:$0xff] }
  0x14   : > { %139 = vst.msk [vmem:[#allocation2 + $0x28] sm:$0xff] %vm133_vm2, %v122_v12  ;;  %138 = vst.msk [vmem:[#allocation2 + $0x20] sm:$0xff] %vm133_vm2, %v121_v13  ;;  %v119_v15 = vld [vmem:[%s1120_s12 + $0x10] sm:$0xff]  ;;  %v118_v16 = vld [vmem:[%s1120_s12 + $0x8] sm:$0xff] }
  0x15   : > { %137 = vst.msk [vmem:[#allocation2 + $0x18] sm:$0xff] %vm133_vm2, %v120_v14  ;;  %136 = vst.msk [vmem:[#allocation2 + $0x10] sm:$0xff] %vm133_vm2, %v119_v15  ;;  %v117_v17 = vld [vmem:[%s1120_s12] sm:$0xff] }
  0x16   : > { %135 = vst.msk [vmem:[#allocation2 + $0x8] sm:$0xff] %vm133_vm2, %v118_v16  ;;  %134 = vst.msk [vmem:[#allocation2] sm:$0xff] %vm133_vm2, %v117_v17  ;;  %v1161_v18 = vld [vmem:[#allocation2 + $0x78] sm:$0xff]  ;;  %v1163_v19 = vld [vmem:[#allocation2 + $0x70] sm:$0xff] }
  0x17   : > { %965 = vmatprep.subr.msk.mxu1 %vm133_vm2, %v1161_v18  ;;  %v1169_v20 = vmul.f32 %v1161_v18, %v1161_v18  ;;  %v1177_v21 = vmul.f32 %v1163_v19, %v1163_v19  ;;  %v1182_v22 = vld [vmem:[#allocation2 + $0x68] sm:$0xff]  ;;  %v1219_v32 = vld [vmem:[#allocation2 + $0x60] sm:$0xff] }
  0x18   : > { %966 = vmatpush3.xpose.msk.msra.mxu1 %vm133_vm2, %v1161_v18  ;;  %v1208_v29 = vmul.f32 %v1182_v22, %v1182_v22  ;;  %v178_v39 = vmul.f32 %v1219_v32, %v1219_v32  ;;  %v1248_v41 = vld [vmem:[#allocation2 + $0x58] sm:$0xff]  ;;  %v1272_v49 = vld [vmem:[#allocation2 + $0x50] sm:$0xff] }
  0x19   : > { %931 = vmatpush3.xpose.msk.msra.mxu0 %vm133_vm2, %v1169_v20  ;;  %967 = vmatprep.subr.msk.mxu1 %vm133_vm2, %v1163_v19  ;;  %v177_v47 = vmul.f32 %v1248_v41, %v1248_v41  ;;  %v1274_v50 = vld [vmem:[#allocation2 + $0x48] sm:$0xff]  ;;  %v1278_v52 = vld [vmem:[#allocation2 + $0x40] sm:$0xff]  ;;  %v176_v55 = vmul.f32 %v1272_v49, %v1272_v49  ;;  %v621_v1 = vsel %vm133_vm2, %v1169_v20, 0.0  ;;  %v618_v2 = vsel %vm133_vm2, %v1177_v21, 0.0 }
  0x1a   : > { %932 = vmatprep.subr.mxu0 %v1093_v0  ;;  %v1250_v42 = vld [vmem:[#allocation2 + $0x38] sm:$0xff]  ;;  %v1256_v44 = vld [vmem:[#allocation2 + $0x30] sm:$0xff]  ;;  %v175_v56 = vmul.f32 %v1274_v50, %v1274_v50  ;;  %v174_v57 = vmul.f32 %v1278_v52, %v1278_v52  ;;  %v615_v62 = vsel %vm133_vm2, %v1208_v29, 0.0  ;;  %v612_v63 = vsel %vm133_vm2, %v178_v39, 0.0 }
  0x1b   : > { %v1221_v33 = vld [vmem:[#allocation2 + $0x28] sm:$0xff]  ;;  %v1229_v36 = vld [vmem:[#allocation2 + $0x20] sm:$0xff]  ;;  %v173_v48 = vmul.f32 %v1250_v42, %v1250_v42  ;;  %v172_v51 = vmul.f32 %v1256_v44, %v1256_v44  ;;  %v609_v60 = vsel %vm133_vm2, %v177_v47, 0.0  ;;  %v606_v61 = vsel %vm133_vm2, %v176_v55, 0.0 }
  0x1c   : > { %v1184_v23 = vld [vmem:[#allocation2 + $0x18] sm:$0xff]  ;;  %v1186_v24 = vld [vmem:[#allocation2 + $0x10] sm:$0xff]  ;;  %968 = vmatpush3.xpose.msk.msra.mxu1 %vm133_vm2, %v1163_v19  ;;  %v1245_v40 = vmul.f32 %v1221_v33, %v1221_v33  ;;  %v1254_v43 = vmul.f32 %v1229_v36, %v1229_v36  ;;  %v603_v58 = vsel %vm133_vm2, %v175_v56, 0.0  ;;  %v600_v59 = vsel %vm133_vm2, %v174_v57, 0.0 }
  0x1d   : > { %v1190_v25 = vmul.f32 %v1186_v24, %v1186_v24  ;;  %v1192_v26 = vld [vmem:[#allocation2 + $0x8] sm:$0xff]  ;;  %v1194_v27 = vld [vmem:[#allocation2] sm:$0xff]  ;;  %933 = vmatpush3.xpose.msk.msra.mxu0 %vm133_vm2, %v1177_v21  ;;  %969 = vmatprep.subr.msk.mxu1 %vm133_vm2, %v1182_v22  ;;  %v1214_v30 = vmul.f32 %v1184_v23, %v1184_v23  ;;  %v597_v53 = vsel %vm133_vm2, %v173_v48, 0.0  ;;  %v594_v54 = vsel %vm133_vm2, %v172_v51, 0.0 }
  0x1e   : > { %v1200_v28 = vmul.f32 %v1194_v27, %v1194_v27  ;;  %997 = vmatprep.mubr.msk.f32.mxu1 %vm133_vm2, %v1194_v27  ;;  %934 = vmatprep.subr.mxu0 %v1093_v0  ;;  %v1225_v34 = vmul.f32 %v1192_v26, %v1192_v26  ;;  %v591_v45 = vsel %vm133_vm2, %v1245_v40, 0.0  ;;  %v588_v46 = vsel %vm133_vm2, %v1254_v43, 0.0 }
  0x1f   : > { %v582_v31 = vsel %vm133_vm2, %v1190_v25, 0.0  ;;  %v585_v37 = vsel %vm133_vm2, %v1214_v30, 0.0 }
  0x20   : > { %v576_v35 = vsel %vm133_vm2, %v1200_v28, 0.0  ;;  %583 = vadd.xlane.f32.xlu1 %v582_v31  ;;  %970 = vmatpush3.xpose.msk.msra.mxu1 %vm133_vm2, %v1182_v22  ;;  %v579_v38 = vsel %vm133_vm2, %v1225_v34, 0.0 }
  0x21   : > { %577 = vadd.xlane.f32.xlu0 %v576_v35  ;;  %935 = vmatpush3.xpose.msk.msra.mxu0 %vm133_vm2, %v1208_v29 }
  0x22   : > { %971 = vmatprep.subr.msk.mxu1 %vm133_vm2, %v1219_v32  ;;  %936 = vmatprep.subr.mxu0 %v1093_v0 }
  0x24   : > { %586 = vadd.xlane.f32.xlu1 %v585_v37  ;;  %972 = vmatpush3.xpose.msk.msra.mxu1 %vm133_vm2, %v1219_v32 }
  0x25   : > { %580 = vadd.xlane.f32.xlu0 %v579_v38  ;;  %937 = vmatpush3.xpose.msk.msra.mxu0 %vm133_vm2, %v178_v39 }
  0x26   : > { %973 = vmatprep.subr.msk.mxu1 %vm133_vm2, %v1248_v41  ;;  %938 = vmatprep.subr.mxu0 %v1093_v0 }
  0x28   : > { %592 = vadd.xlane.f32.xlu1 %v591_v45  ;;  %974 = vmatpush3.xpose.msk.msra.mxu1 %vm133_vm2, %v1248_v41 }
  0x29   : > { %589 = vadd.xlane.f32.xlu0 %v588_v46  ;;  %939 = vmatpush3.xpose.msk.msra.mxu0 %vm133_vm2, %v177_v47 }
  0x2a   : > { %975 = vmatprep.subr.msk.mxu1 %vm133_vm2, %v1272_v49  ;;  %940 = vmatprep.subr.mxu0 %v1093_v0 }
  0x2c   : > { %598 = vadd.xlane.f32.xlu1 %v597_v53  ;;  %976 = vmatpush3.xpose.msk.msra.mxu1 %vm133_vm2, %v1272_v49 }
  0x2d   : > { %595 = vadd.xlane.f32.xlu0 %v594_v54  ;;  %941 = vmatpush3.xpose.msk.msra.mxu0 %vm133_vm2, %v176_v55 }
  0x2e   : > { %977 = vmatprep.subr.msk.mxu1 %vm133_vm2, %v1274_v50  ;;  %942 = vmatprep.subr.mxu0 %v1093_v0 }
  0x30   : > { %604 = vadd.xlane.f32.xlu1 %v603_v58  ;;  %978 = vmatpush3.xpose.msk.msra.mxu1 %vm133_vm2, %v1274_v50 }
  0x31   : > { %601 = vadd.xlane.f32.xlu0 %v600_v59  ;;  %943 = vmatpush3.xpose.msk.msra.mxu0 %vm133_vm2, %v175_v56 }
  0x32   : > { %979 = vmatprep.subr.msk.mxu1 %vm133_vm2, %v1278_v52  ;;  %944 = vmatprep.subr.mxu0 %v1093_v0 }
  0x34   : > { %610 = vadd.xlane.f32.xlu1 %v609_v60  ;;  %980 = vmatpush3.xpose.msk.msra.mxu1 %vm133_vm2, %v1278_v52 }
  0x35   : > { %607 = vadd.xlane.f32.xlu0 %v606_v61  ;;  %945 = vmatpush3.xpose.msk.msra.mxu0 %vm133_vm2, %v174_v57 }
  0x36   : > { %981 = vmatprep.subr.msk.mxu1 %vm133_vm2, %v1250_v42  ;;  %946 = vmatprep.subr.mxu0 %v1093_v0 }
  0x38   : > { %616 = vadd.xlane.f32.xlu1 %v615_v62  ;;  %982 = vmatpush3.xpose.msk.msra.mxu1 %vm133_vm2, %v1250_v42 }
  0x39   : > { %613 = vadd.xlane.f32.xlu0 %v612_v63  ;;  %947 = vmatpush3.xpose.msk.msra.mxu0 %vm133_vm2, %v173_v48 }
  0x3a   : > { %983 = vmatprep.subr.msk.mxu1 %vm133_vm2, %v1256_v44  ;;  %948 = vmatprep.subr.mxu0 %v1093_v0 }
  0x3c   : > { %622 = vadd.xlane.f32.xlu1 %v621_v1  ;;  %984 = vmatpush3.xpose.msk.msra.mxu1 %vm133_vm2, %v1256_v44 }
  0x3d   : > { %619 = vadd.xlane.f32.xlu0 %v618_v2  ;;  %949 = vmatpush3.xpose.msk.msra.mxu0 %vm133_vm2, %v172_v51 }
  0x3e   : > { %985 = vmatprep.subr.msk.mxu1 %vm133_vm2, %v1221_v33  ;;  %950 = vmatprep.subr.mxu0 %v1093_v0 }
  0x40   : > { %986 = vmatpush3.xpose.msk.msra.mxu1 %vm133_vm2, %v1221_v33 }
  0x41   : > { %951 = vmatpush3.xpose.msk.msra.mxu0 %vm133_vm2, %v1245_v40  ;;  %987 = vmatprep.subr.msk.mxu1 %vm133_vm2, %v1229_v36 }
  0x42   : > { %952 = vmatprep.subr.mxu0 %v1093_v0 }
  0x44   : > { %988 = vmatpush3.xpose.msk.msra.mxu1 %vm133_vm2, %v1229_v36 }
  0x45   : > { %953 = vmatpush3.xpose.msk.msra.mxu0 %vm133_vm2, %v1254_v43  ;;  %989 = vmatprep.subr.msk.mxu1 %vm133_vm2, %v1184_v23 }
  0x46   : > { %954 = vmatprep.subr.mxu0 %v1093_v0 }
  0x48   : > { %990 = vmatpush3.xpose.msk.msra.mxu1 %vm133_vm2, %v1184_v23 }
  0x49   : > { %955 = vmatpush3.xpose.msk.msra.mxu0 %vm133_vm2, %v1214_v30  ;;  %991 = vmatprep.subr.msk.mxu1 %vm133_vm2, %v1186_v24 }
  0x4a   : > { %956 = vmatprep.subr.mxu0 %v1093_v0 }
  0x4c   : > { %992 = vmatpush3.xpose.msk.msra.mxu1 %vm133_vm2, %v1186_v24 }
  0x4d   : > { %957 = vmatpush3.xpose.msk.msra.mxu0 %vm133_vm2, %v1190_v25  ;;  %993 = vmatprep.subr.msk.mxu1 %vm133_vm2, %v1192_v26 }
  0x4e   : > { %958 = vmatprep.subr.mxu0 %v1093_v0 }
  0x50   : > { %994 = vmatpush3.xpose.msk.msra.mxu1 %vm133_vm2, %v1192_v26 }
  0x51   : > { %959 = vmatpush3.xpose.msk.msra.mxu0 %vm133_vm2, %v1225_v34  ;;  %995 = vmatprep.subr.msk.mxu1 %vm133_vm2, %v1194_v27 }
  0x52   : > { %960 = vmatprep.subr.mxu0 %v1093_v0  ;;  %v624_v0 = vlaneseq }
  0x54   : > { %996 = vmatpush3.xpose.msk.msra.mxu1 %vm133_vm2, %v1194_v27  ;;  %v1405_v4 = vand.u32 127, %v624_v0  ;;  %v625_v9 = vshrl.u32 %v624_v0, 7 }
  0x55   : > { %961 = vmatpush3.xpose.msk.msra.mxu0 %vm133_vm2, %v1200_v28 }
  0x56   : > { %v626_v12 = vsub.s32 0, %v625_v9 }
  0x57   : > { %998 = vmatmul.mubr.msk.f32.vlgmr.msra.gmra.mxu1 %vm133_vm2, %v1192_v26 }
  0x58   : > { %963 = vmatmul.mubr.msk.f32.vlgmr.msra.gmra.mxu0 %vm133_vm2, %v1096_v3  ;;  %1000 = vmatprep.mubr.msk.f32.mxu1 %vm133_vm2, %v1186_v24 }
  0x5b   : > { %1001 = vmatmul.mubr.msk.f32.gmra.mxu1 %vm133_vm2, %v1184_v23 }
  0x5c   : > { %1003 = vmatprep.mubr.msk.f32.mxu1 %vm133_vm2, %v1229_v36 }
  0x5f   : > { %1004 = vmatmul.mubr.msk.f32.gmra.mxu1 %vm133_vm2, %v1221_v33 }
  0x60   : > { %1006 = vmatprep.mubr.msk.f32.mxu1 %vm133_vm2, %v1256_v44 }
  0x63   : > { %1007 = vmatmul.mubr.msk.f32.gmra.mxu1 %vm133_vm2, %v1250_v42 }
  0x64   : > { %1009 = vmatprep.mubr.msk.f32.mxu1 %vm133_vm2, %v1278_v52 }
  0x67   : > { %1010 = vmatmul.mubr.msk.f32.gmra.mxu1 %vm133_vm2, %v1274_v50 }
  0x68   : > { %1012 = vmatprep.mubr.msk.f32.mxu1 %vm133_vm2, %v1272_v49 }
  0x6b   : > { %1013 = vmatmul.mubr.msk.f32.gmra.mxu1 %vm133_vm2, %v1248_v41 }
  0x6c   : > { %1015 = vmatprep.mubr.msk.f32.mxu1 %vm133_vm2, %v1219_v32 }
  0x6f   : > { %1016 = vmatmul.mubr.msk.f32.gmra.mxu1 %vm133_vm2, %v1182_v22 }
  0x70   : > { %1018 = vmatprep.mubr.msk.f32.mxu1 %vm133_vm2, %v1163_v19 }
  0x73   : > { %1019 = vmatmul.mubr.msk.f32.gmra.mxu1 %vm133_vm2, %v1161_v18 }
  0xa9   : > { %v584_v5 = vpop.xlane.xlu1 %583 }
  0xaa   : > { %v578_v6 = vpop.xlane.xlu0 %577 }
  0xad   : > { %v587_v7 = vpop.xlane.xlu1 %586 }
  0xae   : > { %v581_v8 = vpop.xlane.xlu0 %580 }
  0xb1   : > { %v593_v10 = vpop.xlane.xlu1 %592 }
  0xb2   : > { %v590_v11 = vpop.xlane.xlu0 %589 }
  0xb5   : > { %v599_v14 = vpop.xlane.xlu1 %598 }
  0xb6   : > { %v596_v19 = vpop.xlane.xlu0 %595 }
  0xb9   : > { %v605_v30 = vpop.xlane.xlu1 %604 }
  0xba   : > { %v602_v36 = vpop.xlane.xlu0 %601 }
  0xbd   : > { %v611_v45 = vpop.xlane.xlu1 %610 }
  0xbe   : > { %v608_v50 = vpop.xlane.xlu0 %607 }
  0xc1   : > { %v617_v59 = vpop.xlane.xlu1 %616 }
  0xc2   : > { %v614_v1 = vpop.xlane.xlu0 %613 }
 0x117   : > { %v999_v13 = vpop.f32.mrf.mxu1 }
 0x118   : > { %v299_v15 = vpop.f32.mrf.mxu0  ;;  %v645_v21 = vmul.f32 2.0, %v999_v13 }
 0x119   : > { %v1407_v16 = vrot.slane %v299_v15, %v626_v12  ;;  %v481_v17 = vpop.f32.mrf.mxu1  ;;  %v620_v15 = vpop.xlane.xlu0 %619 }
 0x11a   : > { %v644_v20 = vmul.f32 2.0, %v481_v17  ;;  %v964_v18 = vpop.f32.mrf.mxu0 }
 0x11b   : > { %v628_v22 = vadd.f32 %v1407_v16, %v578_v6  ;;  %v629_v23 = vadd.f32 %v1407_v16, %v581_v8  ;;  %v631_v24 = vadd.f32 %v1407_v16, %v587_v7  ;;  %v1002_v25 = vpop.f32.mrf.mxu1  ;;  %v630_v32 = vadd.f32 %v1407_v16, %v584_v5 }
 0x11c   : > { %v647_v26 = vmul.f32 2.0, %v1002_v25  ;;  %v633_v34 = vadd.f32 %v1407_v16, %v593_v10  ;;  %v632_v39 = vadd.f32 %v1407_v16, %v590_v11  ;;  %v635_v43 = vadd.f32 %v1407_v16, %v599_v14  ;;  %v623_v10 = vpop.xlane.xlu1 %622 }
 0x11d   : > { %v660_v27 = vsub.f32 %v628_v22, %v644_v20  ;;  %v661_v28 = vsub.f32 %v629_v23, %v645_v21  ;;  %v491_v29 = vpop.f32.mrf.mxu1  ;;  %v634_v48 = vadd.f32 %v1407_v16, %v596_v19  ;;  %v637_v53 = vadd.f32 %v1407_v16, %v605_v30 }
 0x11e   : > { %v663_v31 = vsub.f32 %v631_v24, %v647_v26  ;;  %v646_v33 = vmul.f32 2.0, %v491_v29  ;;  %v636_v57 = vadd.f32 %v1407_v16, %v602_v36  ;;  %v639_v62 = vadd.f32 %v1407_v16, %v611_v45 }
 0x11f   : > { %676 = vst [vmem:[#allocation3] sm:$0xff] %v660_v27  ;;  %677 = vst [vmem:[#allocation3 + $0x8] sm:$0xff] %v661_v28  ;;  %v1005_v35 = vpop.f32.mrf.mxu1  ;;  %v638_v0 = vadd.f32 %v1407_v16, %v608_v50  ;;  %v641_v8 = vadd.f32 %v1407_v16, %v617_v59  ;;  %v640_v13 = vadd.f32 %v1407_v16, %v614_v1  ;;  %v1085_v28 = vmov 1e+10  }
 0x120   : > { %679 = vst [vmem:[#allocation3 + $0x18] sm:$0xff] %v663_v31  ;;  %v662_v37 = vsub.f32 %v630_v32, %v646_v33  ;;  %v649_v38 = vmul.f32 2.0, %v1005_v35  ;;  %v643_v20 = vadd.f32 %v1407_v16, %v623_v10  ;;  %v642_v23 = vadd.f32 %v1407_v16, %v620_v15 }
 0x121   : > { %v501_v40 = vpop.f32.mrf.mxu1 }
 0x122   : > { %678 = vst [vmem:[#allocation3 + $0x10] sm:$0xff] %v662_v37  ;;  %v665_v41 = vsub.f32 %v633_v34, %v649_v38  ;;  %v648_v42 = vmul.f32 2.0, %v501_v40 }
 0x123   : > { %v1008_v44 = vpop.f32.mrf.mxu1 }
 0x124   : > { %681 = vst [vmem:[#allocation3 + $0x28] sm:$0xff] %v665_v41  ;;  %v664_v46 = vsub.f32 %v632_v39, %v648_v42  ;;  %v651_v47 = vmul.f32 2.0, %v1008_v44 }
 0x125   : > { %v511_v49 = vpop.f32.mrf.mxu1 }
 0x126   : > { %680 = vst [vmem:[#allocation3 + $0x20] sm:$0xff] %v664_v46  ;;  %v667_v51 = vsub.f32 %v635_v43, %v651_v47  ;;  %v650_v52 = vmul.f32 2.0, %v511_v49 }
 0x127   : > { %v1011_v54 = vpop.f32.mrf.mxu1 }
 0x128   : > { %683 = vst [vmem:[#allocation3 + $0x38] sm:$0xff] %v667_v51  ;;  %v666_v55 = vsub.f32 %v634_v48, %v650_v52  ;;  %v653_v56 = vmul.f32 2.0, %v1011_v54 }
 0x129   : > { %v521_v58 = vpop.f32.mrf.mxu1 }
 0x12a   : > { %682 = vst [vmem:[#allocation3 + $0x30] sm:$0xff] %v666_v55  ;;  %v669_v60 = vsub.f32 %v637_v53, %v653_v56  ;;  %v652_v61 = vmul.f32 2.0, %v521_v58 }
 0x12b   : > { %v1014_v63 = vpop.f32.mrf.mxu1 }
 0x12c   : > { %685 = vst [vmem:[#allocation3 + $0x48] sm:$0xff] %v669_v60  ;;  %v668_v2 = vsub.f32 %v636_v57, %v652_v61  ;;  %v655_v3 = vmul.f32 2.0, %v1014_v63 }
 0x12d   : > { %v531_v5 = vpop.f32.mrf.mxu1 }
 0x12e   : > { %684 = vst [vmem:[#allocation3 + $0x40] sm:$0xff] %v668_v2  ;;  %v671_v6 = vsub.f32 %v639_v62, %v655_v3  ;;  %v654_v7 = vmul.f32 2.0, %v531_v5 }
 0x12f   : > { %v1017_v9 = vpop.f32.mrf.mxu1 }
 0x130   : > { %687 = vst [vmem:[#allocation3 + $0x58] sm:$0xff] %v671_v6  ;;  %v670_v11 = vsub.f32 %v638_v0, %v654_v7  ;;  %v657_v12 = vmul.f32 2.0, %v1017_v9 }
 0x131   : > { %v541_v14 = vpop.f32.mrf.mxu1 }
 0x132   : > { %686 = vst [vmem:[#allocation3 + $0x50] sm:$0xff] %v670_v11  ;;  %v673_v17 = vsub.f32 %v641_v8, %v657_v12  ;;  %v656_v19 = vmul.f32 2.0, %v541_v14 }
 0x133   : > { %v1020_v18 = vpop.f32.mrf.mxu1 }
 0x134   : > { %689 = vst [vmem:[#allocation3 + $0x68] sm:$0xff] %v673_v17  ;;  %v672_v21 = vsub.f32 %v640_v13, %v656_v19  ;;  %v659_v22 = vmul.f32 2.0, %v1020_v18 }
 0x135   : > { %v551_v24 = vpop.f32.mrf.mxu1 }
 0x136   : > { %688 = vst [vmem:[#allocation3 + $0x60] sm:$0xff] %v672_v21  ;;  %v675_v25 = vsub.f32 %v643_v20, %v659_v22  ;;  %v658_v26 = vmul.f32 2.0, %v551_v24 }
 0x138   : > { %691 = vst [vmem:[#allocation3 + $0x78] sm:$0xff] %v675_v25  ;;  %v674_v27 = vsub.f32 %v642_v23, %v658_v26 }
 0x13a   : > { %690 = vst [vmem:[#allocation3 + $0x70] sm:$0xff] %v674_v27 }
 0x13b LB: >> { %s704_s18 = scalar_lea.vmem [#allocation3], %s1083_s16  ;;  %vm707_vm3 = vcmask 1040384   ;;  %s749_s21 = scalar_lea.vmem %s1125_s15, %s1091_s17  ;;  %s1091_s17 = sphi %s1427_s17, %s701_s17   ;;  %v1087_v28 = vphi %v1085_v28, %v706_v28   ;;  %s1083_s16 = sphi %s1425_s16, %s1449_s16  }
 0x13c   : >> { %s701_s17 = sadd.s32 1, %s1091_s17  }
 0x13d   : >> { %p698_p5 = scmp.ge.s32.totalorder %s701_s17, 16  }
 0x141   : >> { %v705_v16 = vld [vmem:[%s704_s18] sm:$0x1] }
 0x142   : >> { %v706_v28 = vmin.f32 %v1087_v28, %v705_v16  }
 0x144   : >> { %v708_v29 = vsel %vm707_vm3, %v706_v28, -inf }
 0x145   : >> { %709 = vmax.xlane.f32.xlu0 %v708_v29 }
 0x1ce   : >> { %v710_v30 = vpop.xlane.xlu0 %709 }
 0x1cf   : >> { %v711_v31 = vrot.slane %v710_v30, 4 }
 0x1d1   : >> { %v712_v32 = vmax.f32 %v710_v30, %v711_v31 }
 0x1d3   : >> { %v713_v33 = vrot.slane %v712_v32, 2 }
 0x1d5   : >> { %v714_v34 = vmax.f32 %v712_v32, %v713_v33 }
 0x1d7   : >> { %v715_v35 = vrot.slane %v714_v34, 1 }
 0x1d9   : >> { %v716_v36 = vmax.f32 %v714_v34, %v715_v35 }
 0x1db   : >> { %1021 = vpush %v716_v36 }
 0x20c   : >> { %s1022_s19 = spop %1021 }
 0x20d   : >> { %v718_v37 = vstv %s1022_s19 }
 0x20e   : >> { %vm719_vm4 = vcmp.eq.f32.partialorder %v706_v28, %v718_v37 }
 0x20f   : >> { %v720_v38 = vsel %vm719_vm4, %v1405_v4, 128 }
 0x210   : >> { %v721_v39 = vsel %vm707_vm3, %v720_v38, 2147483647 }
 0x211   : >> { %v723_v40 = vshra.s32 %v721_v39, 16  ;;  %v722_v42 = vand.u32 65535, %v721_v39 }
 0x213   : >> { %v725_v41 = vcvt.s32.f32 %v723_v40  ;;  %v724_v44 = vcvt.s32.f32 %v722_v42 }
 0x215   : >> { %726 = vmin.xlane.f32.xlu0 %v725_v41 }
 0x29e   : >> { %v727_v43 = vpop.xlane.xlu0 %726 }
 0x29f   : >> { %vm728_vm5 = vcmp.eq.f32.partialorder %v725_v41, %v727_v43  ;;  %v733_v46 = vcvt.f32.s32 %v727_v43 }
 0x2a0   : >> { %v729_v45 = vsel %vm728_vm5, %v724_v44, inf }
 0x2a1   : >> { %730 = vmin.xlane.f32.xlu1 %v729_v45  ;;  %v734_v48 = vshll.u32 %v733_v46, 16 }
 0x32a   : >> { %v731_v47 = vpop.xlane.xlu1 %730 }
 0x32b   : >> { %v732_v49 = vcvt.f32.s32 %v731_v47 }
 0x32d   : >> { %v735_v50 = vadd.s32 %v734_v48, %v732_v49 }
 0x32f   : >> { %v736_v51 = vrot.slane %v735_v50, 4 }
 0x331   : >> { %vm737_vm6 = vcmp.lt.s32.totalorder %v735_v50, %v736_v51 }
 0x332   : >> { %v738_v52 = vsel %vm737_vm6, %v735_v50, %v736_v51 }
 0x333   : >> { %v739_v53 = vrot.slane %v738_v52, 2 }
 0x335   : >> { %vm740_vm7 = vcmp.lt.s32.totalorder %v738_v52, %v739_v53 }
 0x336   : >> { %v741_v54 = vsel %vm740_vm7, %v738_v52, %v739_v53 }
 0x337   : >> { %v742_v55 = vrot.slane %v741_v54, 1 }
 0x339   : >> { %vm743_vm8 = vcmp.lt.s32.totalorder %v741_v54, %v742_v55 }
 0x33a   : >> { %v744_v56 = vsel %vm743_vm8, %v741_v54, %v742_v55 }
 0x33b   : >> { %1023 = vpush %v744_v56 }
 0x36c   : >> { %s1024_s20 = spop %1023 }
 0x36d   : >> { %p746_p4 = scmp.lt.s32.totalorder %s1024_s20, 127  ;;  %700 = sbr.rel (!%p698_p5) target bundleno = 315 (0x13b), region = 63 }
 0x36f   : >> { %s1453_s20 = smov (!%p746_p4, %s1024_s20), 127 }
 0x370   : >> { %v748_v57 = vstv %s1453_s20  ;;  %s1449_s16 = smov %s1453_s20 }
 0x371   : >> { %750 = vst.msk [vmem:[%s749_s21] sm:$0x1] %vm694_vm1, %v748_v57 }
 0x372 PF: > { %s11_s6 = sadd.s32 1, %s1079_s6  }
 0x373   : > { %p8_p6 = scmp.ge.s32.totalorder %s11_s6, 4  }
 0x375   :  { %10 = sbr.rel (!%p8_p6) target bundleno = 1 (0x1), region = 74 }

</bundles_post_ra>
